<compile_context>
chip_gen: v7x
topology: tpu7x:2x2x1
jax: 0.10.0
libtpu: 0.0.40
codegen_flags: <defaults>
</compile_context>

<pallas_src>
import functools

import jax
import jax.numpy as jnp
from jax.experimental import pallas as pl
from jax.experimental.pallas import tpu as pltpu


_L1_IN = 16           # neuron_l1 input width
_L2_IN = 5            # neuron_l2 input width
_GROUP_COLS = 100     # 5*16 + 4*5 features per full group
_GROUP_LANES = 128    # lane-aligned (padded) group width fed to the MXU
_SEGS_PER_GROUP = 9   # 5 l1 segments + 4 l2 segments per full group


# --------------------------------------------------------------------------
# Pallas kernel: one batch-row tile; per lane-aligned 128-col group do
#   y_group = x_group @ W_block + bias  -> already in torch.stack(dim=1) order.
# --------------------------------------------------------------------------
def _embedder_kernel(x_ref, w_ref, b_ref, o_ref, *,
                     n_full_groups, tail_segments, d_model, compute_dtype):
    # x_ref : (TILE_B, n_groups*128)                group-padded activations
    # w_ref : (128, 9*d_model)  compute_dtype       block-diag [w1 x5 ; w2 x4]
    # b_ref : (1,   9*d_model)  f32                 [b1 x5, b2 x4]
    # o_ref : (TILE_B, n_segments*d_model)          lane-dense output tile
    cols_per_group = _SEGS_PER_GROUP * d_model
    n_groups = n_full_groups + (1 if tail_segments else 0)
    tb = x_ref.shape[0]

    w = w_ref[...]                                   # already compute_dtype
    # Hoisted bias broadcast: one broadcast per tile, not one per group.
    b_full = jnp.broadcast_to(b_ref[...], (tb, cols_per_group))

    # Cast activations at most once per tile (not once per group).
    x = None
    if x_ref.dtype != compute_dtype:
        x = x_ref[...].astype(compute_dtype)

    for g in range(n_groups):                        # static unroll (<= 25 dots)
        c0 = g * _GROUP_LANES                        # lane-aligned slice start
        xg = (x_ref[:, c0:c0 + _GROUP_LANES] if x is None
              else x[:, c0:c0 + _GROUP_LANES])
        yg = jnp.dot(xg, w, preferred_element_type=jnp.float32) + b_full
        o0 = g * cols_per_group
        if tail_segments and g == n_full_groups:
            # Partial last group (l1 only): padded input rows are zero, so the
            # unused l1/l2 segments of yg reduce to bias and are discarded.
            o_ref[:, o0:] = yg[:, :tail_segments * d_model].astype(o_ref.dtype)
        else:
            o_ref[:, o0:o0 + cols_per_group] = yg.astype(o_ref.dtype)


# --------------------------------------------------------------------------
# One-time parameter folding (hoisted out of the per-call path).
# --------------------------------------------------------------------------
def prepare_params(params, *, compute_dtype=jnp.float32):
    """Fold (w1, b1, w2, b2) into the padded block-diagonal weight + bias."""
    w1, b1, w2, b2 = params["w1"], params["b1"], params["w2"], params["b2"]
    d_model = int(w1.shape[1])
    w_block = jnp.zeros((_GROUP_LANES, _SEGS_PER_GROUP * d_model), jnp.float32)
    for s in range(5):
        w_block = w_block.at[s * _L1_IN:(s + 1) * _L1_IN,
                             s * d_model:(s + 1) * d_model].set(w1)
    for s in range(4):
        r0 = 5 * _L1_IN + s * _L2_IN
        c0 = (5 + s) * d_model
        w_block = w_block.at[r0:r0 + _L2_IN, c0:c0 + d_model].set(w2)
    b_block = jnp.concatenate([jnp.tile(b1, 5), jnp.tile(b2, 4)])[None, :]
    return {"w_block": w_block.astype(compute_dtype),
            "b_block": b_block.astype(jnp.float32),
            "d_model": d_model}


# --------------------------------------------------------------------------
# Helpers: per-generation defaults, row alignment, group packing.
# --------------------------------------------------------------------------
def _device_defaults():
    kind = ""
    try:
        kind = (getattr(jax.devices()[0], "device_kind", "") or "").lower()
    except Exception:
        pass
    if "v7" in kind:        # 64 MiB VMEM/TC, 2 TCs, 3.2 TB/s HBM
        return {"tile_b": 256, "compute_dtype": jnp.float32,
                "vmem_limit": 48 * 1024 * 1024}
    if "v6" in kind:        # 128 MiB VMEM, bf16 VPU/EUP
        return {"tile_b": 512, "compute_dtype": jnp.float32,
                "vmem_limit": 64 * 1024 * 1024}
    if "v5" in kind and ("lite" in kind or "v5e" in kind):
        # v5e: f32 MXU ~4x slower and block-diag weight inflates FLOPs, so
        # default to bf16 MXU compute (f32 accumulation is kept).
        return {"tile_b": 512, "compute_dtype": jnp.bfloat16,
                "vmem_limit": 64 * 1024 * 1024}
    return {"tile_b": 256, "compute_dtype": jnp.float32,
            "vmem_limit": 48 * 1024 * 1024}


def _row_align(*dtypes):
    align = 8
    for dt in dtypes:
        size = jnp.dtype(dt).itemsize
        if size == 2:
            align = max(align, 16)
        elif size == 1:
            align = max(align, 32)
    return align


def _pack_groups(v, n_groups):
    """(B, n_features) -> (B, n_groups*128): each 100-col group padded to 128."""
    batch, n_features = v.shape
    full_cols = n_groups * _GROUP_COLS
    if n_features < full_cols:
        v = jnp.pad(v, ((0, 0), (0, full_cols - n_features)))
    v = v.reshape(batch, n_groups, _GROUP_COLS)
    v = jnp.pad(v, ((0, 0), (0, 0), (0, _GROUP_LANES - _GROUP_COLS)))
    return v.reshape(batch, n_groups * _GROUP_LANES)


# --------------------------------------------------------------------------
# Wrapper: packs the input, tiles the batch, runs one fused pallas_call and
# reshapes the lane-dense output to (B, n_segments, d_model).
# --------------------------------------------------------------------------
def embedder_neuron_group(v, params, *, compute_dtype=None, out_dtype=None,
                          tile_b=None, vmem_limit_bytes=None):
    """Forward pass of EmbedderNeuronGroup.

    v: (B, 100) or (B, 2464); params is either the raw {w1,b1,w2,b2} dict or
    the output of prepare_params().  Returns (B, 9, d_model) / (B, 220, d_model).
    """
    defaults = _device_defaults()

    if "w_block" in params:                           # pre-folded parameters
        prepared = params
        if (compute_dtype is not None
                and prepared["w_block"].dtype != jnp.dtype(compute_dtype)):
            prepared = dict(prepared,
                            w_block=prepared["w_block"].astype(compute_dtype))
    else:
        if compute_dtype is None:
            compute_dtype = defaults["compute_dtype"]
        prepared = prepare_params(params, compute_dtype=compute_dtype)
    compute_dtype = prepared["w_block"].dtype
    d_model = prepared["d_model"]

    batch, n_features = v.shape
    if n_features == 100:
        n_full, tail_segs = 1, 0
    elif n_features == 2464:
        n_full, tail_segs = 24, 4
    else:
        raise ValueError(
            f"EmbedderNeuronGroup handles 100 or 2464 features, got {n_features}")
    n_groups = n_full + (1 if tail_segs else 0)
    n_segments = n_full * _SEGS_PER_GROUP + tail_segs
    out_cols = n_segments * d_model

    if out_dtype is None:
        out_dtype = v.dtype
    if tile_b is None:
        tile_b = defaults["tile_b"]
    if vmem_limit_bytes is None:
        vmem_limit_bytes = defaults["vmem_limit"]

    # Lane-aligned group packing (each 100-col group -> 128 lanes).
    # TODO(synk): in production fuse this packing into the producer of v.
    v_packed = _pack_groups(v, n_groups)

    # Row tiling.  Sub-32-bit in/out blocks need 16-row sublane alignment.
    row_align = _row_align(v_packed.dtype, out_dtype)
    if batch <= tile_b:
        # Aim for >=2 grid steps so both v7x TensorCores get work.
        half = -(-batch // 2)
        tb = max(row_align, -(-half // row_align) * row_align)
    else:
        tb = max(row_align, -(-tile_b // row_align) * row_align)
    padded_b = -(-batch // tb) * tb
    if padded_b != batch:
        v_packed = jnp.pad(v_packed, ((0, padded_b - batch), (0, 0)))

    kernel = functools.partial(
        _embedder_kernel,
        n_full_groups=n_full, tail_segments=tail_segs,
        d_model=d_model, compute_dtype=compute_dtype)

    out = pl.pallas_call(
        kernel,
        out_shape=jax.ShapeDtypeStruct((padded_b, out_cols), out_dtype),
        grid_spec=pltpu.PrefetchScalarGridSpec(
            num_scalar_prefetch=0,
            grid=(padded_b // tb,),
            in_specs=[
                pl.BlockSpec((tb, n_groups * _GROUP_LANES), lambda i: (i, 0)),
                pl.BlockSpec((_GROUP_LANES, _SEGS_PER_GROUP * d_model),
                             lambda i: (0, 0)),
                pl.BlockSpec((1, _SEGS_PER_GROUP * d_model), lambda i: (0, 0)),
            ],
            out_specs=pl.BlockSpec((tb, out_cols), lambda i: (i, 0)),
        ),
        compiler_params=pltpu.CompilerParams(
            dimension_semantics=("parallel",),
            vmem_limit_bytes=vmem_limit_bytes),
    )(v_packed, prepared["w_block"], prepared["b_block"])

    if padded_b != batch:
        out = out[:batch]
    return out.reshape(batch, n_segments, d_model)


# --------------------------------------------------------------------------
# Deterministic parameter init (nn.Linear(16, d) / nn.Linear(5, d) shapes,
# stored transposed as (in_features, d_model) so y = x @ W + b).
# --------------------------------------------------------------------------
def init_params(d_model, seed=22):
    k1, k2, k3, k4 = jax.random.split(jax.random.PRNGKey(seed), 4)
    bound1 = 1.0 / jnp.sqrt(float(_L1_IN))
    bound2 = 1.0 / jnp.sqrt(float(_L2_IN))
    return {
        "w1": jax.random.uniform(k1, (_L1_IN, d_model), jnp.float32, -bound1, bound1),
        "b1": jax.random.uniform(k2, (d_model,), jnp.float32, -bound1, bound1),
        "w2": jax.random.uniform(k3, (_L2_IN, d_model), jnp.float32, -bound2, bound2),
        "b2": jax.random.uniform(k4, (d_model,), jnp.float32, -bound2, bound2),
    }


# --------------------------------------------------------------------------
# Pure-JAX reference mirroring the PyTorch loops exactly, for verification.
# --------------------------------------------------------------------------
def _segment_plan(n_features):
    segs = []
    if n_features == 100:
        for ndx in range(5):
            segs.append(("l1", ndx * 16))
        for ndx in range(4):
            segs.append(("l2", 5 * 16 + ndx * 5))
    elif n_features == 2464:
        for g in range(25):
            if g == 24:
                for ndx in range(4):
                    segs.append(("l1", g * 100 + ndx * 16))
            else:
                for ndx in range(5):
                    segs.append(("l1", g * 100 + ndx * 16))
                for ndx in range(4):
                    segs.append(("l2", g * 100 + 5 * 16 + ndx * 5))
    else:
        raise ValueError(n_features)
    return segs


def _reference(v, params):
    w1, b1, w2, b2 = params["w1"], params["b1"], params["w2"], params["b2"]
    outs = []
    for kind, s in _segment_plan(v.shape[1]):
        if kind == "l1":
            outs.append(v[:, s:s + 16] @ w1 + b1)
        else:
            outs.append(v[:, s:s + 5] @ w2 + b2)
    return jnp.stack(outs, axis=1)


if __name__ == "__main__":
    d_model, batch = 32, 2
    params = init_params(d_model, seed=22)
    prep_f32 = prepare_params(params, compute_dtype=jnp.float32)   # fold once

    # 100-feature branch -> (B, 9, D), f32 compute.
    v100 = jax.random.normal(jax.random.PRNGKey(0), (batch, 100), jnp.float32)
    out100 = jax.block_until_ready(embedder_neuron_group(
        v100, prep_f32, compute_dtype=jnp.float32))
    assert out100.shape == (batch, 9, d_model), out100.shape
    assert jnp.allclose(out100, _reference(v100, params), atol=1e-4, rtol=1e-4)

    # 2464-feature branch -> (B, 220, D), f32 compute.
    v2464 = jax.random.normal(jax.random.PRNGKey(1), (batch, 2464), jnp.float32)
    out2464 = jax.block_until_ready(embedder_neuron_group(
        v2464, prep_f32, compute_dtype=jnp.float32))
    assert out2464.shape == (batch, 220, d_model), out2464.shape
    assert jnp.allclose(out2464, _reference(v2464, params), atol=1e-4, rtol=1e-4)

    # Row-tiled / padded grid path (grid > 1, B not a multiple of the tile).
    v_big = jax.random.normal(jax.random.PRNGKey(2), (130, 2464), jnp.float32)
    out_big = jax.block_until_ready(embedder_neuron_group(
        v_big, prep_f32, compute_dtype=jnp.float32, tile_b=64))
    assert out_big.shape == (130, 220, d_model), out_big.shape
    assert jnp.allclose(out_big, _reference(v_big, params), atol=1e-4, rtol=1e-4)

    # Per-generation auto defaults (tile size / VMEM limit / compute dtype);
    # loose tolerance because v5e defaults to bf16 MXU compute.
    out_auto = jax.block_until_ready(embedder_neuron_group(v_big, params))
    assert out_auto.shape == (130, 220, d_model), out_auto.shape
    assert jnp.allclose(out_auto, _reference(v_big, params), atol=5e-2, rtol=5e-2)

    # bf16 end-to-end (bf16 activations in, bf16 MXU compute, bf16 out):
    # ~2x less HBM traffic on this mem-bound kernel; f32 accumulation kept.
    prep_bf16 = prepare_params(params, compute_dtype=jnp.bfloat16)
    out_bf16 = jax.block_until_ready(embedder_neuron_group(
        v2464.astype(jnp.bfloat16), prep_bf16, out_dtype=jnp.bfloat16))
    assert out_bf16.shape == (batch, 220, d_model), out_bf16.shape
    assert jnp.allclose(out_bf16.astype(jnp.float32), _reference(v2464, params),
                        atol=5e-2, rtol=5e-2)

    print("KERNEL_OK")
</pallas_src>

<mosaic_0001>
module attributes {stable_mosaic.version = 11 : i64} {
  func.func @_embedder_kernel(%arg0: i32, %arg1: memref<8x128xf32, #tpu.memory_space<vmem>>, %arg2: memref<128x288xf32, #tpu.memory_space<vmem>>, %arg3: memref<1x288xf32, #tpu.memory_space<vmem>>, %arg4: memref<8x288xf32, #tpu.memory_space<vmem>>) attributes {dimension_semantics = [#tpu.dimension_semantics<parallel>], iteration_bounds = array<i64: 1>, scalar_prefetch = 0 : i64, scratch_operands = 0 : i64, tpu.core_type = #tpu.core_type<tc>, window_params = [{transform_indices = @transform_0, window_bounds = array<i64: 8, 128>}, {pipeline_mode = #tpu.pipeline_mode<synchronous>, transform_indices = @transform_1, window_bounds = array<i64: 128, 288>}, {pipeline_mode = #tpu.pipeline_mode<synchronous>, transform_indices = @transform_2, window_bounds = array<i64: 1, 288>}, {transform_indices = @transform_3, window_bounds = array<i64: 8, 288>}]} {
    %c0 = arith.constant 0 : index
    %c0_0 = arith.constant 0 : index
    %0 = vector.load %arg2[%c0, %c0_0] : memref<128x288xf32, #tpu.memory_space<vmem>>, vector<128x288xf32>
    %c0_1 = arith.constant 0 : index
    %c0_2 = arith.constant 0 : index
    %1 = vector.load %arg3[%c0_1, %c0_2] : memref<1x288xf32, #tpu.memory_space<vmem>>, vector<1x288xf32>
    %2 = vector.shape_cast %1 : vector<1x288xf32> to vector<1x288xf32>
    %3 = vector.broadcast %2 : vector<1x288xf32> to vector<8x288xf32>
    %c0_3 = arith.constant 0 : index
    %c0_4 = arith.constant 0 : index
    %4 = vector.load %arg1[%c0_3, %c0_4] : memref<8x128xf32, #tpu.memory_space<vmem>>, vector<8x128xf32>
    %cst = arith.constant dense<0.000000e+00> : vector<8x288xf32>
    %5 = tpu.matmul %4, %0, %cst {dimension_numbers = #tpu.dot_dimension_numbers<[1], [0], [0], [1], [0, 0, 1, 1], [], []>} : vector<8x128xf32>, vector<128x288xf32>, vector<8x288xf32> -> vector<8x288xf32>
    %6 = arith.addf %5, %3 : vector<8x288xf32>
    %c0_5 = arith.constant 0 : index
    %c0_6 = arith.constant 0 : index
    %7 = vector.load %arg4[%c0_5, %c0_6] : memref<8x288xf32, #tpu.memory_space<vmem>>, vector<8x288xf32>
    tpu.vector_store %arg4[%c0_5, %c0_6], %6 {strides = array<i32>} : memref<8x288xf32, #tpu.memory_space<vmem>>, vector<8x288xf32>,
    return
  }
  func.func @transform_0(%arg0: i32) -> (i32, i32) {
    %c0_i32 = arith.constant 0 : i32
    %c0_i32_0 = arith.constant 0 : i32
    return %arg0, %c0_i32 : i32, i32
  }
  func.func @transform_1(%arg0: i32) -> (i32, i32) {
    %c0_i32 = arith.constant 0 : i32
    %c0_i32_0 = arith.constant 0 : i32
    %c0_i32_1 = arith.constant 0 : i32
    return %c0_i32, %c0_i32_0 : i32, i32
  }
  func.func @transform_2(%arg0: i32) -> (i32, i32) {
    %c0_i32 = arith.constant 0 : i32
    %c0_i32_0 = arith.constant 0 : i32
    %c0_i32_1 = arith.constant 0 : i32
    return %c0_i32, %c0_i32_0 : i32, i32
  }
  func.func @transform_3(%arg0: i32) -> (i32, i32) {
    %c0_i32 = arith.constant 0 : i32
    %c0_i32_0 = arith.constant 0 : i32
    return %arg0, %c0_i32 : i32, i32
  }
}

</mosaic_0001>

<bundles_post_ra>
// kernel: tpu_custom_call.1
= control target key start
LH: loop header
LB: loop body
LE: loop exit
PB: predicated region body
PF: predicated region fallthrough
CT: control target
= control target key end

     0   :  { %v376_v4 = vmov 0.0|0.0   ;;  %v377_v8 = vmov 0.0   ;;  %vm378_vm0 = vmmov 0   ;;  %s570_s0 = inlined_call_operand.vmem [shape: f32[8,128], index: 0, kind: input, shape index: {}]   ;;  %s571_s1 = inlined_call_operand.vmem [shape: f32[128,288], index: 1, kind: input, shape index: {}]   ;;  %s572_s2 = inlined_call_operand.vmem [shape: f32[1,288], index: 2, kind: input, shape index: {}]   ;;  %s573_s3 = inlined_call_operand.hbm [shape: f32[8,288], index: 3, kind: output, shape index: {}]  }
   0x1   :  { %v16_v0 = vld [vmem:[%s571_s1 + $0x8] sm:$0xff]  ;;  %v19_v1 = vld [vmem:[%s571_s1 + $0x20] sm:$0xff]  ;;  %324 = vmatprep.subr.bf16.mxu1 %v376_v4  ;;  %v18_v5 = vld [vmem:[%s571_s1 + $0x18] sm:$0xff]  ;;  %145 = vmatprep.mubr.f32.mxu0 %v377_v8 }
   0x2   :  { %v15_v2 = vld [vmem:[%s571_s1] sm:$0xff]  ;;  %v292_v3 = vpack.c.bf16 %v19_v1, %v16_v0  ;;  %v17_v6 = vld [vmem:[%s571_s1 + $0x10] sm:$0xff]  ;;  %v20_v7 = vld [vmem:[%s571_s1 + $0x28] sm:$0xff]  ;;  %289 = vmatprep.mubr.msk.f32.mxu1 %vm378_vm0, %v377_v8 }
   0x3   :  { %v294_v9 = vpack.c.bf16 %v18_v5, %v15_v2  ;;  %v325_v10 = vpack.c.bf16 %v20_v7, %v17_v6  ;;  %v22_v11 = vld [vmem:[%s571_s1 + $0x38] sm:$0xff]  ;;  %v25_v12 = vld [vmem:[%s571_s1 + $0x50] sm:$0xff]  ;;  %v24_v15 = vld [vmem:[%s571_s1 + $0x48] sm:$0xff] }
   0x4   :  { %v21_v13 = vld [vmem:[%s571_s1 + $0x30] sm:$0xff]  ;;  %293 = vmatprep.subr.bf16.mxu0 %v292_v3  ;;  %v296_v14 = vpack.c.bf16 %v25_v12, %v22_v11  ;;  %v23_v16 = vld [vmem:[%s571_s1 + $0x40] sm:$0xff]  ;;  %v26_v17 = vld [vmem:[%s571_s1 + $0x58] sm:$0xff] }
   0x5   :  { %295 = vmatpush1.bf16.msra.mxu0 %v294_v9  ;;  %326 = vmatpush3.bf16.msra.mxu1 %v325_v10  ;;  %v298_v18 = vpack.c.bf16 %v24_v15, %v21_v13  ;;  %v328_v19 = vpack.c.bf16 %v26_v17, %v23_v16  ;;  %v28_v20 = vld [vmem:[%s571_s1 + $0x68] sm:$0xff]  ;;  %v31_v21 = vld [vmem:[%s571_s1 + $0x80] sm:$0xff]  ;;  %v30_v24 = vld [vmem:[%s571_s1 + $0x78] sm:$0xff] }
   0x6   :  { %v27_v22 = vld [vmem:[%s571_s1 + $0x60] sm:$0xff]  ;;  %297 = vmatprep.subr.bf16.mxu0 %v296_v14  ;;  %327 = vmatprep.subr.bf16.mxu1 %v376_v4  ;;  %v300_v23 = vpack.c.bf16 %v31_v21, %v28_v20  ;;  %v29_v25 = vld [vmem:[%s571_s1 + $0x70] sm:$0xff]  ;;  %v32_v26 = vld [vmem:[%s571_s1 + $0x88] sm:$0xff] }
   0x7   :  { %v34_v27 = vld [vmem:[%s571_s1 + $0x98] sm:$0xff]  ;;  %v37_v28 = vld [vmem:[%s571_s1 + $0xb0] sm:$0xff]  ;;  %v302_v29 = vpack.c.bf16 %v30_v24, %v27_v22  ;;  %v331_v30 = vpack.c.bf16 %v32_v26, %v29_v25  ;;  %v36_v33 = vld [vmem:[%s571_s1 + $0xa8] sm:$0xff] }
   0x8   :  { %v33_v31 = vld [vmem:[%s571_s1 + $0x90] sm:$0xff]  ;;  %v304_v32 = vpack.c.bf16 %v37_v28, %v34_v27  ;;  %v35_v34 = vld [vmem:[%s571_s1 + $0xa0] sm:$0xff]  ;;  %v38_v35 = vld [vmem:[%s571_s1 + $0xb8] sm:$0xff] }
   0x9   :  { %299 = vmatpush1.bf16.msra.mxu0 %v298_v18  ;;  %329 = vmatpush3.bf16.msra.mxu1 %v328_v19  ;;  %v40_v36 = vld [vmem:[%s571_s1 + $0xc8] sm:$0xff]  ;;  %v43_v37 = vld [vmem:[%s571_s1 + $0xe0] sm:$0xff]  ;;  %v306_v38 = vpack.c.bf16 %v36_v33, %v33_v31  ;;  %v334_v39 = vpack.c.bf16 %v38_v35, %v35_v34  ;;  %v42_v42 = vld [vmem:[%s571_s1 + $0xd8] sm:$0xff] }
   0xa   :  { %301 = vmatprep.subr.bf16.mxu0 %v300_v23  ;;  %330 = vmatprep.subr.bf16.mxu1 %v376_v4  ;;  %v39_v40 = vld [vmem:[%s571_s1 + $0xc0] sm:$0xff]  ;;  %v308_v41 = vpack.c.bf16 %v43_v37, %v40_v36  ;;  %v41_v43 = vld [vmem:[%s571_s1 + $0xd0] sm:$0xff]  ;;  %v44_v44 = vld [vmem:[%s571_s1 + $0xe8] sm:$0xff] }
   0xb   :  { %v46_v45 = vld [vmem:[%s571_s1 + $0xf8] sm:$0xff]  ;;  %v49_v46 = vld [vmem:[%s571_s1 + $0x110] sm:$0xff]  ;;  %v310_v47 = vpack.c.bf16 %v42_v42, %v39_v40  ;;  %v337_v48 = vpack.c.bf16 %v44_v44, %v41_v43 }
   0xc   :  { %v45_v49 = vld [vmem:[%s571_s1 + $0xf0] sm:$0xff] }
   0xd   :  { %303 = vmatpush1.bf16.msra.mxu0 %v302_v29  ;;  %332 = vmatpush3.bf16.msra.mxu1 %v331_v30 }
   0xe   :  { %305 = vmatprep.subr.bf16.mxu0 %v304_v32  ;;  %333 = vmatprep.subr.bf16.mxu1 %v376_v4 }
  0x11   :  { %307 = vmatpush1.bf16.msra.mxu0 %v306_v38  ;;  %335 = vmatpush3.bf16.msra.mxu1 %v334_v39 }
  0x12   :  { %8 = vsyncpa [#allocation3], 0  ;;  %309 = vmatprep.subr.bf16.mxu0 %v308_v41  ;;  %336 = vmatprep.subr.bf16.mxu1 %v376_v4  ;;  %v312_v50 = vpack.c.bf16 %v49_v46, %v46_v45  ;;  %v48_v51 = vld [vmem:[%s571_s1 + $0x108] sm:$0xff]  ;;  %v47_v52 = vld [vmem:[%s571_s1 + $0x100] sm:$0xff]  ;;  %v65_v12 = vlaneseq  ;;  %s379_s30 = smov [#allocation2]   ;;  %vm224_vm1 = vcmask 261120  }
  0x13   :  { %v50_v53 = vld [vmem:[%s571_s1 + $0x118] sm:$0xff]  ;;  %v52_v54 = vld [vmem:[%s571_s1 + $0x128] sm:$0xff]  ;;  %v55_v55 = vld [vmem:[%s571_s1 + $0x140] sm:$0xff]  ;;  %v314_v56 = vpack.c.bf16 %v48_v51, %v45_v49  ;;  %s232_s4 = sshll.u32 %s379_s30, 4  ;;  %s233_s4 = int_to_ptr.vmem [resolvable:$true] %s232_s4 }
  0x14   :  { %v340_v57 = vpack.c.bf16 %v50_v53, %v47_v52  ;;  %v51_v58 = vld [vmem:[%s571_s1 + $0x120] sm:$0xff]  ;;  %v316_v59 = vpack.c.bf16 %v55_v55, %v52_v54  ;;  %v54_v60 = vld [vmem:[%s571_s1 + $0x138] sm:$0xff]  ;;  %v53_v61 = vld [vmem:[%s571_s1 + $0x130] sm:$0xff]  ;;  %v66_v13 = vshrl.u32 %v65_v12, 7  ;;  %p357_p1 = scmp.lt.s32.totalorder %s233_s4, %s233_s4 }
  0x15   :  { %311 = vmatpush1.bf16.msra.mxu0 %v310_v47  ;;  %338 = vmatpush3.bf16.msra.mxu1 %v337_v48  ;;  %v56_v62 = vld [vmem:[%s571_s1 + $0x148] sm:$0xff]  ;;  %v58_v63 = vld [vmem:[%s571_s1 + $0x158] sm:$0xff]  ;;  %v61_v0 = vld [vmem:[%s571_s1 + $0x170] sm:$0xff]  ;;  %v318_v1 = vpack.c.bf16 %v54_v60, %v51_v58 }
  0x16   :  { %313 = vmatprep.subr.bf16.mxu0 %v312_v50  ;;  %339 = vmatprep.subr.bf16.mxu1 %v376_v4  ;;  %v343_v2 = vpack.c.bf16 %v56_v62, %v53_v61  ;;  %v57_v3 = vld [vmem:[%s571_s1 + $0x150] sm:$0xff]  ;;  %v320_v5 = vpack.c.bf16 %v61_v0, %v58_v63  ;;  %v60_v6 = vld [vmem:[%s571_s1 + $0x168] sm:$0xff]  ;;  %v59_v7 = vld [vmem:[%s571_s1 + $0x160] sm:$0xff]  ;;  %v67_v14 = vsub.s32 0, %v66_v13  ;;  %v75_v15 = vsub.s32 2, %v66_v13 }
  0x17   :  { %v62_v8 = vld [vmem:[%s571_s1 + $0x178] sm:$0xff]  ;;  %v322_v9 = vpack.c.bf16 %v60_v6, %v57_v3  ;;  %v80_v11 = vld [vmem:[%s570_s0] sm:$0xff]  ;;  %v71_v17 = vsub.s32 1, %v66_v13  ;;  %s352_s0 = scalar_lea.vmem %s233_s4, 384 }
  0x18   :  { %v346_v10 = vpack.c.bf16 %v62_v8, %v59_v7  ;;  %v63_v16 = vld [vmem:[%s572_s2] sm:$0x7]  ;;  %p353_p0 = scmp.ne.s32.totalorder %s233_s4, %s352_s0  ;;  %p358_p2 = scmp.lt.s32.totalorder %s352_s0, %s352_s0 }
  0x19   :  { %315 = vmatpush1.bf16.msra.mxu0 %v314_v56  ;;  %341 = vmatpush3.bf16.msra.mxu1 %v340_v57  ;;  %v68_v18 = vrot.slane %v63_v16, %v67_v14  ;;  %v76_v19 = vrot.slane %v63_v16, %v75_v15 }
  0x1a   :  { %317 = vmatprep.subr.bf16.mxu0 %v316_v59  ;;  %342 = vmatprep.subr.bf16.mxu1 %v376_v4  ;;  %p359_p3 = por %p358_p2, %p357_p1 }
  0x1c   :  { %p360_p4 = pnand %p359_p3, %p353_p0 }
  0x1d   :  { %319 = vmatpush1.bf16.msra.mxu0 %v318_v1  ;;  %344 = vmatpush3.bf16.msra.mxu1 %v343_v2 }
  0x1e   :  { %321 = vmatprep.subr.bf16.mxu0 %v320_v5  ;;  %345 = vmatprep.subr.bf16.mxu1 %v376_v4  ;;  %v72_v4 = vrot.slane %v63_v16, %v71_v17 }
  0x21   :  { %323 = vmatpush1.bf16.msra.mxu0 %v322_v9  ;;  %347 = vmatpush3.bf16.msra.mxu1 %v346_v10 }
  0x24   :  { %146 = vmatmul.mubr.f32.vlgmr.msra.gmra.mrb[0].mxu0 %v80_v11  ;;  %290 = vmatmul.mubr.f32.vlgmr.msra.gmra.mrb[0].mxu1 %v80_v11 }
  0xf7   :  { %v147_v20 = vpop.f32.mrb[0].mxu0  ;;  %v218_v21 = vpop.f32.mrb[0].mxu1 }
  0xf8   :  { %v148_v22 = vadd.f32 %v147_v20, %v68_v18  ;;  %v219_v23 = vadd.f32 %v218_v21, %v76_v19  ;;  %v149_v24 = vpop.f32.mrb[1].mxu0  ;;  %v291_v25 = vpop.f32.mrb[1].mxu1 }
  0xf9   :  { %v150_v26 = vadd.f32 %v149_v24, %v72_v4 }
  0xfa   :  { %222 = vst [vmem:[#allocation2] sm:$0xff] %v148_v22  ;;  %225 = vst.msk [vmem:[#allocation2 + $0x10] sm:$0xff] %vm224_vm1, %v219_v23 }
  0xfb   :  { %223 = vst [vmem:[#allocation2 + $0x8] sm:$0xff] %v150_v26 }
  0xfc   :  { %363 = shalt.err (!%p360_p4)
}
  0xfd   :  { %s364_s6 = scalar_lea.hbm %s573_s3, 384 }
  0xfe   :  { %p365_p5 = scmp.ne.s32.totalorder %s573_s3, %s364_s6  ;;  %p368_p6 = scmp.lt.u32.totalorder %s364_s6, %s573_s3 }
 0x100   :  { %p370_p7 = pnand %p368_p6, %p365_p5 }
 0x102   :  { %373 = shalt.err (!%p370_p7)
}
 0x103   :  { %235 = dma.vmem_to_hbm [thread:$0]  %s233_s4, 384, %s573_s3, [#allocation3]  }
 0x104   :  { %374 = dma.done.wait [#allocation3], 384  }
 0x105   :  { %375 = vsyncadd [#allocation3], 4294966912 }
 0x106   :  { %239 = vsyncpa [#allocation3], 1 }

</bundles_post_ra>
